<compile_context>
chip_gen: v5e
topology: v5e:2x2
jax: 0.10.0
libtpu: 0.0.40
codegen_flags: <defaults>
</compile_context>

<pallas_src>
import jax
import jax.numpy as jnp
from jax.experimental import pallas as pl
from jax.experimental.pallas import tpu as pltpu


# --------------------------------------------------------------------------- #
# Hardware budget helpers
# --------------------------------------------------------------------------- #
def _tpu_budget():
    """(vmem_capacity_bytes, num_tensorcores) with conservative fallbacks."""
    vmem_cap = 64 * 1024 * 1024          # v7x per-TC VMEM (smallest of v5e/v6e/v7x)
    num_cores = 1
    try:
        info = pltpu.get_tpu_info()
        for name in ("vmem_capacity_bytes", "vmem_bytes", "vmem_capacity"):
            v = getattr(info, name, None)
            if v:
                vmem_cap = int(v)
                break
        for name in ("num_cores", "tensorcores_per_chip", "cores_per_chip",
                     "num_tensorcores"):
            v = getattr(info, name, None)
            if v:
                num_cores = int(v)
                break
    except Exception:
        pass
    return vmem_cap, num_cores


def _pick_batch_block(n, lout, bytes_per_lane, vmem_budget, num_cores):
    """Pick batch block B (divisor of n), maximizing the lane extent B*Lout
    subject to: lane-dense stores (B*Lout % 128 == 0, or full coverage),
    per-block VMEM budget, >=2 grid steps for pipelining, and (when >1 TC is
    present) a step count that is a multiple of the core count."""
    best = None
    for d in range(1, n + 1):
        if n % d:
            continue
        bl = d * lout
        steps = n // d
        # Mosaic lane constraint: lane block multiple of 128 or full extent.
        if bl % 128 != 0 and d != n:
            continue
        fits = bl * bytes_per_lane <= vmem_budget
        lane_dense = bl % 128 == 0
        pipelined = steps >= 2
        balanced = (num_cores <= 1) or (steps % num_cores == 0)
        key = (fits, lane_dense, pipelined, balanced, bl)
        if best is None or key > best[0]:
            best = (key, d)
    return best[1]


# --------------------------------------------------------------------------- #
# Pallas kernel
# --------------------------------------------------------------------------- #
def _shift_taps(v, pos, lout, bl):
    """Return (v[l-1], v[l+1]) taps via XLU rolls; lane mask zeroes the padding
    column at every length-Lout segment boundary inside the block."""
    left = jnp.where(pos == 0, jnp.zeros_like(v), pltpu.roll(v, 1, axis=1))
    right = jnp.where(pos == lout - 1, jnp.zeros_like(v),
                      pltpu.roll(v, bl - 1, axis=1))
    return left, right


def _make_kernel(cout, lout, bl, proj, compute_dtype):
    def kernel(x_ref, w1_ref, b1_ref, w2_ref, b2_ref, o_ref):
        pos = jax.lax.broadcasted_iota(jnp.int32, (1, bl), 1) % lout
        xs = x_ref[...]

        if proj:
            # x_ref is the (3*Cin, bl) im2col slab (center tap at sublane 0).
            # One fused dot produces conv1 rows [0:Cout) and the 1x1 shortcut
            # rows [Cout:2*Cout) (its BN bias is folded into b2).
            hs = jnp.dot(w1_ref[...], xs, preferred_element_type=jnp.float32)
            h = jnp.maximum(hs[0:cout, :] + b1_ref[...], 0.0)
            sc = hs[cout:2 * cout, :]
        else:
            # stride=1 identity block: conv1 taps built in-register from the
            # plain (Cin, bl) slab — no im2col, 3x fewer input HBM bytes.
            xl, xr = _shift_taps(xs, pos, lout, bl)
            h = jnp.dot(w1_ref[0], xs, preferred_element_type=jnp.float32)
            h = h + jnp.dot(w1_ref[1], xl, preferred_element_type=jnp.float32)
            h = h + jnp.dot(w1_ref[2], xr, preferred_element_type=jnp.float32)
            h = jnp.maximum(h + b1_ref[...], 0.0)
            sc = xs.astype(jnp.float32)          # identity shortcut

        # conv2 (k=3, stride=1, pad=1): cast once after ReLU, three
        # accumulating dots — no sublane concat through the store slot.
        hc = h.astype(compute_dtype)
        hl, hr = _shift_taps(hc, pos, lout, bl)
        out = jnp.dot(w2_ref[0], hc, preferred_element_type=jnp.float32)
        out = out + jnp.dot(w2_ref[1], hl, preferred_element_type=jnp.float32)
        out = out + jnp.dot(w2_ref[2], hr, preferred_element_type=jnp.float32)

        out = out + b2_ref[...] + sc
        o_ref[...] = jnp.maximum(out, 0.0).astype(o_ref.dtype)

    return kernel


def _fold_bn(gamma, beta, mean, var, eps=1e-5):
    scale = gamma / jnp.sqrt(var + eps)
    bias = beta - mean * scale
    return scale.reshape(-1, 1), bias.reshape(-1, 1)


# --------------------------------------------------------------------------- #
# Wrapper
# --------------------------------------------------------------------------- #
def residual_block(x, params, stride=1, compute_dtype=jnp.float32,
                   out_dtype=jnp.float32):
    """x: (N, Cin, L) float32 (PyTorch NCW). Returns (N, Cout, Lout) out_dtype."""
    N, Cin, L = x.shape
    w1 = params["w1"]                                      # (Cout, Cin, 3)
    Cout = w1.shape[0]
    proj = (stride != 1) or (Cin != Cout)
    Lout = (L + 2 - 3) // stride + 1                       # k=3, pad=1

    tap_order = (1, 0, 2)                                  # center, left, right

    # Fold eval-mode BN scale into conv weights; keep biases separate.
    s1, b1 = _fold_bn(*params["bn1"])
    s2, b2 = _fold_bn(*params["bn2"])
    w2_t = (jnp.stack([params["w2"][:, :, k] for k in tap_order], axis=0)
            * s2).astype(compute_dtype)                    # (3, Cout, Cout)

    if proj:
        # im2col in the wrapper (stride decimation + taps on sublanes).
        xp = jnp.transpose(jnp.pad(x, ((0, 0), (0, 0), (1, 1))), (1, 0, 2))
        span = stride * (Lout - 1) + 1
        taps = [xp[:, :, k:k + span:stride] for k in tap_order]
        x_slab = (jnp.concatenate(taps, axis=0)
                  .reshape(3 * Cin, N * Lout).astype(compute_dtype))
        # Fuse the 1x1 shortcut into conv1's LHS (shortcut uses the center tap).
        w1_flat = jnp.concatenate([w1[:, :, k] for k in tap_order], axis=1) * s1
        ss, bs = _fold_bn(*params["bns"])
        ws = params["ws"][:, :, 0] * ss                    # (Cout, Cin)
        ws_pad = jnp.concatenate(
            [ws, jnp.zeros((Cout, 2 * Cin), ws.dtype)], axis=1)
        w1_arg = jnp.concatenate([w1_flat, ws_pad], axis=0).astype(compute_dtype)
        b2_arg = b2 + bs                                   # shortcut bias folded
        cin_rows = 3 * Cin
        w1_spec = pl.BlockSpec((2 * Cout, 3 * Cin), lambda i: (0, 0))
    else:
        # No im2col: plain lane-dense (Cin, N*L) slab; taps built in-kernel.
        x_slab = (jnp.transpose(x, (1, 0, 2))
                  .reshape(Cin, N * L).astype(compute_dtype))
        w1_arg = (jnp.stack([w1[:, :, k] for k in tap_order], axis=0)
                  * s1).astype(compute_dtype)              # (3, Cout, Cin)
        b2_arg = b2
        cin_rows = Cin
        w1_spec = pl.BlockSpec((3, Cout, Cin), lambda i: (0, 0, 0))

    # VMEM-aware block size: maximize B*Lout under a per-block byte budget.
    isz = jnp.dtype(compute_dtype).itemsize
    osz = jnp.dtype(out_dtype).itemsize
    bytes_per_lane = (2 * cin_rows * isz          # double-buffered input slab
                      + 2 * Cout * osz            # double-buffered output slab
                      + (cin_rows + 6 * Cout) * 4)  # f32 intermediates (h, taps, acc, sc)
    vmem_cap, num_cores = _tpu_budget()
    vmem_limit = min(100 * 1024 * 1024, int(0.75 * vmem_cap))
    budget = int(0.6 * vmem_limit)
    B = _pick_batch_block(N, Lout, bytes_per_lane, budget, num_cores)
    bl = B * Lout
    grid = (N // B,)

    kernel = _make_kernel(Cout, Lout, bl, proj, compute_dtype)

    in_specs = [
        pl.BlockSpec((cin_rows, bl), lambda i: (0, i)),
        w1_spec,
        pl.BlockSpec((Cout, 1), lambda i: (0, 0)),
        pl.BlockSpec((3, Cout, Cout), lambda i: (0, 0, 0)),
        pl.BlockSpec((Cout, 1), lambda i: (0, 0)),
    ]
    args = [x_slab, w1_arg, b1, w2_t, b2_arg]

    flops = 2 * (Cout * 3 * Cin + Cout * 3 * Cout
                 + (Cout * Cin if proj else 0)) * N * Lout
    bytes_accessed = (x_slab.size * isz + Cout * N * Lout * osz
                      + sum(int(a.size) * isz for a in (w1_arg, w2_t))
                      + 2 * Cout * 4)
    cost = pl.CostEstimate(flops=flops, transcendentals=0,
                           bytes_accessed=bytes_accessed)

    y = pl.pallas_call(
        kernel,
        out_shape=jax.ShapeDtypeStruct((Cout, N * Lout), out_dtype),
        grid_spec=pltpu.PrefetchScalarGridSpec(
            num_scalar_prefetch=0,
            grid=grid,
            in_specs=in_specs,
            out_specs=pl.BlockSpec((Cout, bl), lambda i: (0, i)),
        ),
        compiler_params=pltpu.CompilerParams(
            dimension_semantics=("parallel",),
            vmem_limit_bytes=vmem_limit),
        cost_estimate=cost,
    )(*args)

    # Back to PyTorch NCW layout (module boundary).
    return jnp.transpose(y.reshape(Cout, N, Lout), (1, 0, 2))


# --------------------------------------------------------------------------- #
# Pure-JAX reference (mirrors the PyTorch forward, eval-mode BN)
# --------------------------------------------------------------------------- #
def _conv1d_ref(x, w, stride, pad):
    N, Cin, L = x.shape
    Cout, _, K = w.shape
    xp = jnp.pad(x, ((0, 0), (0, 0), (pad, pad)))
    Lout = (L + 2 * pad - K) // stride + 1
    out = jnp.zeros((N, Cout, Lout), jnp.float32)
    for k in range(K):
        xs = xp[:, :, k:k + stride * (Lout - 1) + 1:stride]
        out = out + jnp.einsum("oi,nil->nol", w[:, :, k], xs)
    return out


def _bn_ref(y, p, eps=1e-5):
    g, b, m, v = p
    return (y - m[None, :, None]) / jnp.sqrt(v[None, :, None] + eps) \
        * g[None, :, None] + b[None, :, None]


def ref_forward(x, params, stride=1):
    Cin = x.shape[1]
    Cout = params["w1"].shape[0]
    h = jax.nn.relu(_bn_ref(_conv1d_ref(x, params["w1"], stride, 1),
                            params["bn1"]))
    left = _bn_ref(_conv1d_ref(h, params["w2"], 1, 1), params["bn2"])
    if stride != 1 or Cin != Cout:
        sc = _bn_ref(_conv1d_ref(x, params["ws"], stride, 0), params["bns"])
    else:
        sc = x
    return jax.nn.relu(left + sc)


# --------------------------------------------------------------------------- #
# Main
# --------------------------------------------------------------------------- #
if __name__ == "__main__":
    key = jax.random.PRNGKey(0)
    ks = jax.random.split(key, 20)

    def bn_params(k, c):
        k1, k2, k3, k4 = jax.random.split(k, 4)
        gamma = 1.0 + 0.1 * jax.random.normal(k1, (c,), jnp.float32)
        beta = 0.1 * jax.random.normal(k2, (c,), jnp.float32)
        mean = 0.1 * jax.random.normal(k3, (c,), jnp.float32)
        var = 0.5 + jnp.abs(jax.random.normal(k4, (c,), jnp.float32))
        return (gamma, beta, mean, var)

    def make_params(keys, cin, cout):
        return {
            "w1": 0.2 * jax.random.normal(keys[0], (cout, cin, 3), jnp.float32),
            "bn1": bn_params(keys[1], cout),
            "w2": 0.2 * jax.random.normal(keys[2], (cout, cout, 3), jnp.float32),
            "bn2": bn_params(keys[3], cout),
            "ws": 0.2 * jax.random.normal(keys[4], (cout, cin, 1), jnp.float32),
            "bns": bn_params(keys[5], cout),
        }

    # --- test 1: identity shortcut (stride=1, Cin == Cout, no im2col) --------
    N, C, L = 8, 16, 64
    p1 = make_params(ks[0:6], C, C)
    x1 = jax.random.normal(ks[6], (N, C, L), jnp.float32)
    out1 = jax.block_until_ready(residual_block(x1, p1, stride=1))
    ref1 = ref_forward(x1, p1, stride=1)
    assert out1.shape == ref1.shape == (N, C, L), out1.shape
    err1 = float(jnp.max(jnp.abs(out1 - ref1)))
    assert err1 < 1e-2, f"stride=1 max abs err {err1}"

    # --- test 2: projection shortcut (stride=2, Cin != Cout, fused 1x1) ------
    Cin2, Cout2 = 16, 32
    p2 = make_params(ks[7:13], Cin2, Cout2)
    x2 = jax.random.normal(ks[13], (N, Cin2, L), jnp.float32)
    out2 = jax.block_until_ready(residual_block(x2, p2, stride=2))
    ref2 = ref_forward(x2, p2, stride=2)
    assert out2.shape == ref2.shape == (N, Cout2, L // 2), out2.shape
    err2 = float(jnp.max(jnp.abs(out2 - ref2)))
    assert err2 < 1e-2, f"stride=2 max abs err {err2}"

    # --- test 3: bf16 MXU operands / f32 accumulation (all generations) ------
    out3 = jax.block_until_ready(
        residual_block(x1, p1, stride=1, compute_dtype=jnp.bfloat16))
    err3 = float(jnp.max(jnp.abs(out3 - ref1)))
    assert err3 < 2e-1, f"bf16 max abs err {err3}"

    print("KERNEL_OK")
</pallas_src>

<mosaic_0001>
module attributes {stable_mosaic.version = 11 : i64} {
  func.func @kernel(%arg0: i32, %arg1: memref<16x256xf32, #tpu.memory_space<vmem>>, %arg2: memref<3x16x16xf32, #tpu.memory_space<vmem>>, %arg3: memref<16x1xf32, #tpu.memory_space<vmem>>, %arg4: memref<3x16x16xf32, #tpu.memory_space<vmem>>, %arg5: memref<16x1xf32, #tpu.memory_space<vmem>>, %arg6: memref<16x256xf32, #tpu.memory_space<vmem>>) attributes {dimension_semantics = [#tpu.dimension_semantics<parallel>], iteration_bounds = array<i64: 2>, scalar_prefetch = 0 : i64, scratch_operands = 0 : i64, tpu.core_type = #tpu.core_type<tc>, window_params = [{transform_indices = @transform_0, window_bounds = array<i64: 16, 256>}, {pipeline_mode = #tpu.pipeline_mode<synchronous>, transform_indices = @transform_1, window_bounds = array<i64: 3, 16, 16>}, {pipeline_mode = #tpu.pipeline_mode<synchronous>, transform_indices = @transform_2, window_bounds = array<i64: 16, 1>}, {pipeline_mode = #tpu.pipeline_mode<synchronous>, transform_indices = @transform_3, window_bounds = array<i64: 3, 16, 16>}, {pipeline_mode = #tpu.pipeline_mode<synchronous>, transform_indices = @transform_4, window_bounds = array<i64: 16, 1>}, {transform_indices = @transform_5, window_bounds = array<i64: 16, 256>}]} {
    %0 = tpu.iota {dimensions = array<i32: 1>} : vector<1x256xi32>
    %c64_i32 = arith.constant 64 : i32
    %c0_i32 = arith.constant 0 : i32
    %1 = arith.cmpi eq, %c64_i32, %c0_i32 : i32
    %c1_i32 = arith.constant 1 : i32
    %2 = arith.select %1, %c1_i32, %c64_i32 : i32
    %3 = vector.broadcast %2 : i32 to vector<1x256xi32>
    %4 = arith.remsi %0, %3 : vector<1x256xi32>
    %c0_i32_0 = arith.constant 0 : i32
    %5 = vector.broadcast %c0_i32_0 : i32 to vector<1x256xi32>
    %6 = arith.cmpi ne, %4, %5 : vector<1x256xi32>
    %c0_i32_1 = arith.constant 0 : i32
    %7 = vector.broadcast %c0_i32_1 : i32 to vector<1x256xi32>
    %8 = arith.cmpi slt, %4, %7 : vector<1x256xi32>
    %c0_i32_2 = arith.constant 0 : i32
    %9 = arith.cmpi slt, %2, %c0_i32_2 : i32
    %10 = vector.broadcast %9 : i1 to vector<1x256xi1>
    %11 = vector.broadcast %10 : vector<1x256xi1> to vector<1x256xi1>
    %12 = arith.xori %8, %11 : vector<1x256xi1>
    %13 = arith.andi %12, %6 : vector<1x256xi1>
    %14 = vector.broadcast %2 : i32 to vector<1x256xi32>
    %15 = arith.addi %4, %14 : vector<1x256xi32>
    %16 = arith.select %13, %15, %4 : vector<1x256xi1>, vector<1x256xi32>
    %c0 = arith.constant 0 : index
    %c0_3 = arith.constant 0 : index
    %17 = vector.load %arg1[%c0, %c0_3] : memref<16x256xf32, #tpu.memory_space<vmem>>, vector<16x256xf32>
    %c0_i32_4 = arith.constant 0 : i32
    %18 = vector.broadcast %c0_i32_4 : i32 to vector<1x256xi32>
    %19 = arith.cmpi eq, %16, %18 : vector<1x256xi32>
    %cst = arith.constant 0.000000e+00 : f32
    %20 = vector.broadcast %cst : f32 to vector<16x256xf32>
    %c1_i32_5 = arith.constant 1 : i32
    %21 = tpu.dynamic_rotate %17 by %c1_i32_5 dim 1 : vector<16x256xf32>, i32 -> vector<16x256xf32>
    %22 = vector.shape_cast %19 : vector<1x256xi1> to vector<1x256xi1>
    %23 = vector.broadcast %22 : vector<1x256xi1> to vector<16x256xi1>
    %24 = arith.select %23, %20, %21 : vector<16x256xi1>, vector<16x256xf32>
    %c63_i32 = arith.constant 63 : i32
    %25 = vector.broadcast %c63_i32 : i32 to vector<1x256xi32>
    %26 = arith.cmpi eq, %16, %25 : vector<1x256xi32>
    %cst_6 = arith.constant 0.000000e+00 : f32
    %27 = vector.broadcast %cst_6 : f32 to vector<16x256xf32>
    %c255_i32 = arith.constant 255 : i32
    %28 = tpu.dynamic_rotate %17 by %c255_i32 dim 1 : vector<16x256xf32>, i32 -> vector<16x256xf32>
    %29 = vector.shape_cast %26 : vector<1x256xi1> to vector<1x256xi1>
    %30 = vector.broadcast %29 : vector<1x256xi1> to vector<16x256xi1>
    %31 = arith.select %30, %27, %28 : vector<16x256xi1>, vector<16x256xf32>
    %c0_7 = arith.constant 0 : index
    %c0_8 = arith.constant 0 : index
    %c0_9 = arith.constant 0 : index
    %32 = vector.load %arg2[%c0_7, %c0_8, %c0_9] : memref<3x16x16xf32, #tpu.memory_space<vmem>>, vector<1x16x16xf32>
    %33 = vector.shape_cast %32 : vector<1x16x16xf32> to vector<16x16xf32>
    %cst_10 = arith.constant dense<0.000000e+00> : vector<16x256xf32>
    %34 = tpu.matmul %33, %17, %cst_10 {dimension_numbers = #tpu.dot_dimension_numbers<[1], [0], [0], [1], [0, 0, 1, 1], [], []>} : vector<16x16xf32>, vector<16x256xf32>, vector<16x256xf32> -> vector<16x256xf32>
    %c1 = arith.constant 1 : index
    %c0_11 = arith.constant 0 : index
    %c0_12 = arith.constant 0 : index
    %35 = vector.load %arg2[%c1, %c0_11, %c0_12] : memref<3x16x16xf32, #tpu.memory_space<vmem>>, vector<1x16x16xf32>
    %36 = vector.shape_cast %35 : vector<1x16x16xf32> to vector<16x16xf32>
    %cst_13 = arith.constant dense<0.000000e+00> : vector<16x256xf32>
    %37 = tpu.matmul %36, %24, %cst_13 {dimension_numbers = #tpu.dot_dimension_numbers<[1], [0], [0], [1], [0, 0, 1, 1], [], []>} : vector<16x16xf32>, vector<16x256xf32>, vector<16x256xf32> -> vector<16x256xf32>
    %38 = arith.addf %34, %37 : vector<16x256xf32>
    %c2 = arith.constant 2 : index
    %c0_14 = arith.constant 0 : index
    %c0_15 = arith.constant 0 : index
    %39 = vector.load %arg2[%c2, %c0_14, %c0_15] : memref<3x16x16xf32, #tpu.memory_space<vmem>>, vector<1x16x16xf32>
    %40 = vector.shape_cast %39 : vector<1x16x16xf32> to vector<16x16xf32>
    %cst_16 = arith.constant dense<0.000000e+00> : vector<16x256xf32>
    %41 = tpu.matmul %40, %31, %cst_16 {dimension_numbers = #tpu.dot_dimension_numbers<[1], [0], [0], [1], [0, 0, 1, 1], [], []>} : vector<16x16xf32>, vector<16x256xf32>, vector<16x256xf32> -> vector<16x256xf32>
    %42 = arith.addf %38, %41 : vector<16x256xf32>
    %c0_17 = arith.constant 0 : index
    %c0_18 = arith.constant 0 : index
    %43 = vector.load %arg3[%c0_17, %c0_18] : memref<16x1xf32, #tpu.memory_space<vmem>>, vector<16x1xf32>
    %44 = vector.broadcast %43 : vector<16x1xf32> to vector<16x256xf32>
    %45 = arith.addf %42, %44 : vector<16x256xf32>
    %cst_19 = arith.constant 0.000000e+00 : f32
    %46 = vector.broadcast %cst_19 : f32 to vector<16x256xf32>
    %47 = arith.maximumf %45, %46 : vector<16x256xf32>
    %c0_i32_20 = arith.constant 0 : i32
    %48 = vector.broadcast %c0_i32_20 : i32 to vector<1x256xi32>
    %49 = arith.cmpi eq, %16, %48 : vector<1x256xi32>
    %cst_21 = arith.constant 0.000000e+00 : f32
    %50 = vector.broadcast %cst_21 : f32 to vector<16x256xf32>
    %c1_i32_22 = arith.constant 1 : i32
    %51 = tpu.dynamic_rotate %47 by %c1_i32_22 dim 1 : vector<16x256xf32>, i32 -> vector<16x256xf32>
    %52 = vector.shape_cast %49 : vector<1x256xi1> to vector<1x256xi1>
    %53 = vector.broadcast %52 : vector<1x256xi1> to vector<16x256xi1>
    %54 = arith.select %53, %50, %51 : vector<16x256xi1>, vector<16x256xf32>
    %c63_i32_23 = arith.constant 63 : i32
    %55 = vector.broadcast %c63_i32_23 : i32 to vector<1x256xi32>
    %56 = arith.cmpi eq, %16, %55 : vector<1x256xi32>
    %cst_24 = arith.constant 0.000000e+00 : f32
    %57 = vector.broadcast %cst_24 : f32 to vector<16x256xf32>
    %c255_i32_25 = arith.constant 255 : i32
    %58 = tpu.dynamic_rotate %47 by %c255_i32_25 dim 1 : vector<16x256xf32>, i32 -> vector<16x256xf32>
    %59 = vector.shape_cast %56 : vector<1x256xi1> to vector<1x256xi1>
    %60 = vector.broadcast %59 : vector<1x256xi1> to vector<16x256xi1>
    %61 = arith.select %60, %57, %58 : vector<16x256xi1>, vector<16x256xf32>
    %c0_26 = arith.constant 0 : index
    %c0_27 = arith.constant 0 : index
    %c0_28 = arith.constant 0 : index
    %62 = vector.load %arg4[%c0_26, %c0_27, %c0_28] : memref<3x16x16xf32, #tpu.memory_space<vmem>>, vector<1x16x16xf32>
    %63 = vector.shape_cast %62 : vector<1x16x16xf32> to vector<16x16xf32>
    %cst_29 = arith.constant dense<0.000000e+00> : vector<16x256xf32>
    %64 = tpu.matmul %63, %47, %cst_29 {dimension_numbers = #tpu.dot_dimension_numbers<[1], [0], [0], [1], [0, 0, 1, 1], [], []>} : vector<16x16xf32>, vector<16x256xf32>, vector<16x256xf32> -> vector<16x256xf32>
    %c1_30 = arith.constant 1 : index
    %c0_31 = arith.constant 0 : index
    %c0_32 = arith.constant 0 : index
    %65 = vector.load %arg4[%c1_30, %c0_31, %c0_32] : memref<3x16x16xf32, #tpu.memory_space<vmem>>, vector<1x16x16xf32>
    %66 = vector.shape_cast %65 : vector<1x16x16xf32> to vector<16x16xf32>
    %cst_33 = arith.constant dense<0.000000e+00> : vector<16x256xf32>
    %67 = tpu.matmul %66, %54, %cst_33 {dimension_numbers = #tpu.dot_dimension_numbers<[1], [0], [0], [1], [0, 0, 1, 1], [], []>} : vector<16x16xf32>, vector<16x256xf32>, vector<16x256xf32> -> vector<16x256xf32>
    %68 = arith.addf %64, %67 : vector<16x256xf32>
    %c2_34 = arith.constant 2 : index
    %c0_35 = arith.constant 0 : index
    %c0_36 = arith.constant 0 : index
    %69 = vector.load %arg4[%c2_34, %c0_35, %c0_36] : memref<3x16x16xf32, #tpu.memory_space<vmem>>, vector<1x16x16xf32>
    %70 = vector.shape_cast %69 : vector<1x16x16xf32> to vector<16x16xf32>
    %cst_37 = arith.constant dense<0.000000e+00> : vector<16x256xf32>
    %71 = tpu.matmul %70, %61, %cst_37 {dimension_numbers = #tpu.dot_dimension_numbers<[1], [0], [0], [1], [0, 0, 1, 1], [], []>} : vector<16x16xf32>, vector<16x256xf32>, vector<16x256xf32> -> vector<16x256xf32>
    %72 = arith.addf %68, %71 : vector<16x256xf32>
    %c0_38 = arith.constant 0 : index
    %c0_39 = arith.constant 0 : index
    %73 = vector.load %arg5[%c0_38, %c0_39] : memref<16x1xf32, #tpu.memory_space<vmem>>, vector<16x1xf32>
    %74 = vector.broadcast %73 : vector<16x1xf32> to vector<16x256xf32>
    %75 = arith.addf %72, %74 : vector<16x256xf32>
    %76 = arith.addf %75, %17 : vector<16x256xf32>
    %cst_40 = arith.constant 0.000000e+00 : f32
    %77 = vector.broadcast %cst_40 : f32 to vector<16x256xf32>
    %78 = arith.maximumf %76, %77 : vector<16x256xf32>
    %c0_41 = arith.constant 0 : index
    %c0_42 = arith.constant 0 : index
    %79 = vector.load %arg6[%c0_41, %c0_42] : memref<16x256xf32, #tpu.memory_space<vmem>>, vector<16x256xf32>
    tpu.vector_store %arg6[%c0_41, %c0_42], %78 {strides = array<i32>} : memref<16x256xf32, #tpu.memory_space<vmem>>, vector<16x256xf32>,
    return
  }
  func.func @transform_0(%arg0: i32) -> (i32, i32) {
    %c0_i32 = arith.constant 0 : i32
    %c0_i32_0 = arith.constant 0 : i32
    return %c0_i32, %arg0 : i32, i32
  }
  func.func @transform_1(%arg0: i32) -> (i32, i32, i32) {
    %c0_i32 = arith.constant 0 : i32
    %c0_i32_0 = arith.constant 0 : i32
    %c0_i32_1 = arith.constant 0 : i32
    %c0_i32_2 = arith.constant 0 : i32
    return %c0_i32, %c0_i32_0, %c0_i32_1 : i32, i32, i32
  }
  func.func @transform_2(%arg0: i32) -> (i32, i32) {
    %c0_i32 = arith.constant 0 : i32
    %c0_i32_0 = arith.constant 0 : i32
    %c0_i32_1 = arith.constant 0 : i32
    return %c0_i32, %c0_i32_0 : i32, i32
  }
  func.func @transform_3(%arg0: i32) -> (i32, i32, i32) {
    %c0_i32 = arith.constant 0 : i32
    %c0_i32_0 = arith.constant 0 : i32
    %c0_i32_1 = arith.constant 0 : i32
    %c0_i32_2 = arith.constant 0 : i32
    return %c0_i32, %c0_i32_0, %c0_i32_1 : i32, i32, i32
  }
  func.func @transform_4(%arg0: i32) -> (i32, i32) {
    %c0_i32 = arith.constant 0 : i32
    %c0_i32_0 = arith.constant 0 : i32
    %c0_i32_1 = arith.constant 0 : i32
    return %c0_i32, %c0_i32_0 : i32, i32
  }
  func.func @transform_5(%arg0: i32) -> (i32, i32) {
    %c0_i32 = arith.constant 0 : i32
    %c0_i32_0 = arith.constant 0 : i32
    return %c0_i32, %arg0 : i32, i32
  }
}

</mosaic_0001>

<bundles_post_ra>
// kernel: tpu_custom_call.1
= control target key start
LH: loop header
LB: loop body
LE: loop exit
PB: predicated region body
PF: predicated region fallthrough
CT: control target
= control target key end

     0   :  { %10 = vsyncpa [#allocation3], 0  ;;  %s1555_s0 = inlined_call_operand.hbm [shape: f32[16,512], index: 0, kind: input, shape index: {}]   ;;  %s1556_s1 = inlined_call_operand.hbm [shape: f32[3,16,16], index: 1, kind: input, shape index: {}]   ;;  %s1557_s2 = inlined_call_operand.vmem [shape: f32[16,1], index: 2, kind: input, shape index: {}]   ;;  %s1558_s3 = inlined_call_operand.hbm [shape: f32[3,16,16], index: 3, kind: input, shape index: {}]   ;;  %s1559_s4 = inlined_call_operand.vmem [shape: f32[16,1], index: 4, kind: input, shape index: {}]   ;;  %s1560_s5 = inlined_call_operand.hbm [shape: f32[16,512], index: 5, kind: output, shape index: {}]  }
   0x1   :  { %12 = vsyncpa [#allocation3 + $0x1], 0 }
   0x2   :  { %13 = vsyncpa [#allocation6], 0 }
   0x3   :  { %14 = vsyncpa [#allocation4], 0 }
   0x4   :  { %16 = vsyncpa [#allocation4 + $0x1], 0  ;;  %s1248_s18 = smov 0   ;;  %s1250_s19 = smov 0  }
   0x5   :  { %s1252_s20 = smov 0   ;;  %s1254_s21 = smov 0  }
   0x6 LB: > { %s1269_s22 = sadd.s32 4294967295, %s1203_s21   ;;  %s882_s23 = sadd.s32 4294967294, %s1203_s21   ;;  %s1203_s21 = sphi %s1254_s21, %s1578_s21   ;;  %s1199_s20 = sphi %s1252_s20, %s1577_s20   ;;  %s1195_s19 = sphi %s1250_s19, %s1576_s19   ;;  %s1191_s18 = sphi %s1248_s18, %s1575_s18  }
   0x7   : > { %p42_p0 = scmp.ne.s32.totalorder %s1195_s19, %s1191_s18  ;;  %p43_p1 = scmp.eq.s32.totalorder %s1269_s22, 0 }
   0x8   : > { %p150_p2 = scmp.eq.s32.totalorder %s1269_s22, 1  ;;  %p156_p3 = scmp.eq.s32.totalorder %s882_s23, 1 }
   0x9   : > { %p1278_p4 = por %p43_p1, %p42_p0  ;;  %p883_p5 = scmp.ge.s32.totalorder %s1203_s21, 1 }
   0xa   : > { %p1283_p6 = por %p156_p3, %p42_p0  ;;  %p163_p7 = scmp.lt.s32.totalorder %s1203_s21, 3 }
   0xb   : > { %s174_s28 = sshll.u32 %s1556_s1, 4  ;;  %s1205_s30 = smov [#allocation5]   ;;  %s175_s28 = int_to_ptr.hbm [resolvable:$true] %s174_s28 }
   0xc   : > { %p1291_p8 = pnand %p883_p5, %p163_p7  ;;  %s176_s6 = sshll.u32 %s1205_s30, 4  ;;  %s177_s6 = int_to_ptr.vmem [resolvable:$true] %s176_s6 }
   0xd   : > { %s191_s9 = sshll.u32 %s1558_s3, 4  ;;  %s1206_s10 = smov 128   ;;  %s192_s9 = int_to_ptr.hbm [resolvable:$true] %s191_s9 }
   0xe   : > { %p974_p9 = pneg %p1291_p8  ;;  %s1207_s11 = smov 8  }
   0xf   : > { %s1208_s12 = smov [#allocation7]   ;;  %s1304_s14 = sadd.s32 1, %s1203_s21  }
  0x10   : > { %p975_p10 = pnand %p974_p9, %p43_p1  ;;  %s193_s13 = sshll.u32 %s1208_s12, 4  ;;  %s194_s13 = int_to_ptr.vmem [resolvable:$true] %s193_s13 }
  0x11   : > { %s29_s15 = sadd.s32 1, %s1199_s20  ;;  %s26_s16 = ssub.s32 %s1203_s21, %s1304_s14 }
  0x12   : > { %977 = dma.hbm_to_vmem [thread:$0]  (!%p975_p10), %s175_s28, 768, %s177_s6, [#allocation6], %s1206_s10, %s1206_s10, %s1207_s11  }
  0x13   : > { %980 = dma.hbm_to_vmem [thread:$0]  (!%p975_p10), %s192_s9, 768, %s194_s13, [#allocation6], %s1206_s10, %s1206_s10, %s1207_s11  }
  0x14   : > { %p36_p12 = scmp.ne.s32.totalorder %s1199_s20, %s1195_s19  ;;  %p27_p13 = scmp.eq.s32.totalorder %s26_s16, 0 }
  0x15   : > { %p37_p0 = scmp.eq.s32.totalorder %s1203_s21, 0  ;;  %p991_p5 = scmp.lt.s32.totalorder %s1203_s21, 2 }
  0x16   : > { %p1314_p3 = por %p150_p2, %p36_p12  ;;  %s210_s26 = sand.u32 1, %s1199_s20  }
  0x17   : > { %s1320_s23 = scalar_select %p27_p13, %s1199_s20, %s29_s15  }
  0x18   : > { %p38_p7 = por %p37_p0, %p36_p12  ;;  %s887_s27 = sshll.u32 %s210_s26, 5 }
  0x19   : > { %s956_s28 = sshll.u32 %s1203_s21, 4  ;;  %s214_s8 = scalar_lea.vmem [#allocation2], %s887_s27 }
  0x1a   : > { %s219_s7 = scalar_lea.hbm %s1555_s0, %s956_s28  ;;  %s222_s9 = sshll.u32 %s214_s8, 4  ;;  %s223_s9 = int_to_ptr.vmem [resolvable:$true] %s222_s9 }
  0x1b   : > { %s220_s10 = sshll.u32 %s219_s7, 4  ;;  %p1327_p2 = pnand %p991_p5, %p38_p7  ;;  %s221_s10 = int_to_ptr.hbm [resolvable:$true] %s220_s10 }
  0x1c   : > { %s211_s12 = scalar_lea.sflag [#allocation3], %s210_s26  ;;  %s1103_s13 = sshra.s32 %s221_s10, 4  ;;  %s1104_s13 = int_to_ptr.hbm [resolvable:$true] %s1103_s13 }
  0x1d   : > { %s1105_s15 = scalar_lea.hbm %s1104_s13, 32  ;;  %p1107_p10 = pneg %p1327_p2 }
  0x1e   : > { %p1106_p9 = scmp.ne.s32.totalorder %s1104_s13, %s1105_s15  ;;  %s1110_s28 = scalar_lea.hbm %s1555_s0, 64 }
  0x1f   : > { %p1111_p0 = scmp.lt.s32.totalorder %s1104_s13, %s1555_s0  ;;  %p1112_p5 = scmp.lt.s32.totalorder %s1110_s28, %s1105_s15 }
  0x20   : > { %p1108_p12 = pnand %p1107_p10, %p1106_p9 }
  0x21   : > { %p1113_p7 = por %p1112_p5, %p1111_p0 }
  0x22   : > { %p1109_p13 = pneg %p1108_p12 }
  0x24   : > { %p1114_p11 = pnand %p1113_p7, %p1109_p13 }
  0x26   : > { %1117 = shalt.err (!%p1114_p11)
}
  0x27   : > { %s1209_s26 = smov 512   ;;  %s1210_s7 = smov 256  }
  0x28   : > { %s1211_s8 = smov 16   ;;  %234 = sbr.rel (%p1291_p8) target bundleno = 628 (0x274), region = 40 }
  0x29   : > { %984 = dma.hbm_to_vmem [thread:$0]  (!%p1327_p2), %s221_s10, 512, %s223_s9, %s211_s12, %s1209_s26, %s1210_s7, %s1211_s8  }
  0x2a   : > { %s1344_s16 = sand.u32 (!%p1291_p8), 1, %s1195_s19  }
  0x2b   : > { %s891_s13 = sshll.u32 (!%p1291_p8), %s1344_s16, 5  ;;  %s237_s15 = scalar_lea.sflag (!%p1291_p8), [#allocation3], %s1344_s16 }
  0x2c   : > { %s240_s27 = scalar_lea.vmem (!%p1291_p8), [#allocation2], %s891_s13 }
  0x2d   : > { %1178 = dma.done.wait (%p1278_p4), %s237_s15, 512  }
  0x2e   : > { %1180 = vsyncadd (%p1278_p4), %s237_s15, 4294966784 }
  0x2f   : > { %1182 = dma.done.wait (%p43_p1), [#allocation6], 1536  }
  0x30   : > { %1184 = vsyncadd (%p43_p1), [#allocation6], 4294965760  ;;  %v1358_v0 = vld [vmem:[%s240_s27 + $0x10] sm:$0xff]  ;;  %v1360_v1 = vld [vmem:[%s240_s27] sm:$0xff]  ;;  %s1212_s29 = smov 1   ;;  %s1213_s24 = smov 127   ;;  %v280_v6 = vlaneseq }
  0x31   : > { %315 = vrot.lane.b32.xlu0 %v1358_v0, %s1212_s29  ;;  %313 = vrot.lane.b32.xlu1 %v1360_v1, %s1212_s29  ;;  %v1366_v2 = vld [vmem:[%s240_s27 + $0x18] sm:$0xff]  ;;  %v1372_v3 = vld [vmem:[%s240_s27 + $0x8] sm:$0xff]  ;;  %v357_v4 = vld [vmem:[#allocation5] sm:$0xff]  ;;  %vm362_vm0 = vcmask 130048   ;;  %v1214_v16 = vmov 0   ;;  %s957_s7 = sshll.u32 %s1269_s22, 4 }
  0x32   : > { %338 = vrot.lane.b32.xlu2 %v1358_v0, %s1213_s24  ;;  %435 = vmatpush.msra.mxu2 %v1358_v0  ;;  %v358_v5 = vld [vmem:[#allocation5 + $0x8] sm:$0xff]  ;;  %v1390_v7 = vand.u32 127, %v280_v6  ;;  %v526_v14 = vld [vmem:[%s1557_s2] sm:$0xff]  ;;  %v360_v24 = vld [vmem:[#allocation5 + $0x10] sm:$0xff]  ;;  %s277_s8 = scalar_lea.vmem [#allocation8], %s891_s13  ;;  %s775_s13 = scalar_lea.sflag [#allocation4], %s1344_s16 }
  0x33   : > { %458 = vmatpush.msra.mxu3 %v1366_v2  ;;  %v527_v15 = vld [vmem:[%s1557_s2 + $0x8] sm:$0xff]  ;;  %1041 = vset.pattern.permute.xlu0 %v1214_v16  ;;  %v361_v35 = vld [vmem:[#allocation5 + $0x18] sm:$0xff]  ;;  %v468_v36 = vld [vmem:[#allocation5 + $0x20] sm:$0xff]  ;;  %s1153_s28 = scalar_lea.hbm %s1560_s5, 64 }
  0x34   : > { %436 = vmatpush.msra.mxu2 %v1360_v1  ;;  %v282_v9 = vadd.s32 128, %v1390_v7  ;;  %v287_v12 = vand.u32 63, %v1390_v7  ;;  %vm321_vm1 = vcmp.lt.s32.totalorder %v1390_v7, 1  ;;  %1040 = vset.pattern.permute.xlu2 %v1214_v16  ;;  %vm344_vm4 = vcmp.lt.s32.totalorder %v1390_v7, 127  ;;  %v469_v37 = vld [vmem:[#allocation5 + $0x28] sm:$0xff] }
  0x35   : > { %459 = vmatpush.msra.mxu3 %v1372_v3  ;;  %907 = vmatmul.msk.f32.vlgmr.msra.gmra.mxu2 %vm362_vm0, %v357_v4 }
  0x36   : > { %909 = vmatmul.msk.f32.vlgmr.msra.gmra.mxu3 %vm362_vm0, %v357_v4  ;;  %v294_v13 = vand.u32 63, %v282_v9  ;;  %vm1401_vm2 = vcmp.ne.s32.totalorder %v287_v12, 0  ;;  %1042 = vset.pattern.permute.xlu1 %v1214_v16  ;;  %vm1418_vm5 = vcmp.ne.s32.totalorder %v287_v12, 63  ;;  %v747_v9 = vld [vmem:[%s1559_s4 + $0x8] sm:$0xff]  ;;  %v746_v16 = vld [vmem:[%s1559_s4] sm:$0xff] }
  0x38   : > { %vm1405_vm3 = vcmp.ne.s32.totalorder %v294_v13, 0  ;;  %vm1422_vm6 = vcmp.ne.s32.totalorder %v294_v13, 63 }
  0x39   : > { %319 = vrot.lane.b32.xlu0 %v1366_v2, %s1212_s29  ;;  %317 = vrot.lane.b32.xlu1 %v1372_v3, %s1212_s29 }
  0x3a   : > { %342 = vrot.lane.b32.xlu2 %v1366_v2, %s1213_s24 }
  0x3d   : > { %908 = vmatmul.msk.f32.gmra.mxu2 %vm362_vm0, %v358_v5 }
  0x3e   : > { %910 = vmatmul.msk.f32.gmra.mxu3 %vm362_vm0, %v358_v5 }
  0x41   : > { %336 = vrot.lane.b32.xlu0 %v1360_v1, %s1213_s24  ;;  %340 = vrot.lane.b32.xlu1 %v1372_v3, %s1213_s24 }
  0x42   : > { %535 = vperm.xlu2 %1040, %v527_v15  }
  0x49   : > { %530 = vperm.xlu0 %1041, %v526_v14  }
  0x8c   : > { %v339_v8 = vpop.permute.xlu2 %338 }
  0x94   : > { %v343_v17 = vpop.permute.xlu2 %342 }
  0x95   : > { %v346_v29 = vsel %vm344_vm4, %v339_v8, %v343_v17  ;;  %v348_v30 = vsel %vm344_vm4, %v343_v17, %v339_v8 }
  0x9c   : > { %v536_v53 = vpop.permute.xlu2 %535 }
  0xa3   : > { %v316_v10 = vpop.permute.xlu0 %315  ;;  %v314_v11 = vpop.permute.xlu1 %313 }
  0xab   : > { %v320_v20 = vpop.permute.xlu0 %319  ;;  %v318_v21 = vpop.permute.xlu1 %317 }
  0xac   : > { %v325_v22 = vsel %vm321_vm1, %v320_v20, %v316_v10  ;;  %v323_v23 = vsel %vm321_vm1, %v316_v10, %v320_v20  ;;  %v324_v27 = vsel %vm321_vm1, %v318_v21, %v314_v11  ;;  %v322_v28 = vsel %vm321_vm1, %v314_v11, %v318_v21  ;;  %v578_v10 = vld [vmem:[#allocation7] sm:$0xff]  ;;  %v579_v11 = vld [vmem:[#allocation7 + $0x8] sm:$0xff] }
  0xad   : > { %896 = vmatpush.msk.msra.mxu0 %vm1401_vm2, %v325_v22  ;;  %902 = vmatpush.msk.msra.mxu1 %vm1405_vm3, %v323_v23  ;;  %v581_v22 = vld [vmem:[#allocation7 + $0x10] sm:$0xff] }
  0xaf   : > { %898 = vmatpush.msk.msra.mxu0 %vm1401_vm2, %v324_v27  ;;  %904 = vmatpush.msk.msra.mxu1 %vm1405_vm3, %v322_v28 }
  0xb0   : > { %899 = vmatmul.msk.f32.vlgmr.msra.gmra.mxu0 %vm362_vm0, %v360_v24  ;;  %905 = vmatmul.msk.f32.vlgmr.msra.gmra.mxu1 %vm362_vm0, %v360_v24 }
  0xb1   : > { %912 = vmatpush.msk.msrb.mxu0 %vm1418_vm5, %v346_v29  ;;  %918 = vmatpush.msk.msrb.mxu1 %vm1422_vm6, %v348_v30  ;;  %v582_v29 = vld [vmem:[#allocation7 + $0x18] sm:$0xff] }
  0xb3   : > { %v337_v31 = vpop.permute.xlu0 %336  ;;  %v341_v32 = vpop.permute.xlu1 %340 }
  0xb4   : > { %v345_v33 = vsel %vm344_vm4, %v337_v31, %v341_v32  ;;  %v347_v34 = vsel %vm344_vm4, %v341_v32, %v337_v31 }
  0xb5   : > { %914 = vmatpush.msk.msrb.mxu0 %vm1418_vm5, %v345_v33  ;;  %920 = vmatpush.msk.msrb.mxu1 %vm1422_vm6, %v347_v34  ;;  %v688_v33 = vld [vmem:[#allocation7 + $0x20] sm:$0xff]  ;;  %v689_v34 = vld [vmem:[#allocation7 + $0x28] sm:$0xff] }
  0xb8   : > { %900 = vmatmul.msk.f32.gmra.mxu0 %vm362_vm0, %v361_v35  ;;  %906 = vmatmul.msk.f32.gmra.mxu1 %vm362_vm0, %v361_v35  ;;  %v438_v43 = vpop.f32.mrf.mxu2 }
  0xb9   : > { %v461_v40 = vpop.f32.mrf.mxu3 }
  0xbb   : > { %v531_v59 = vpop.permute.xlu0 %530 }
  0xc0   : > { %915 = vmatmul.msk.f32.vlgmr.msrb.gmra.mxu0 %vm362_vm0, %v468_v36  ;;  %921 = vmatmul.msk.f32.vlgmr.msrb.gmra.mxu1 %vm362_vm0, %v468_v36  ;;  %v441_v48 = vpop.f32.mrf.mxu2 }
  0xc1   : > { %v464_v46 = vpop.f32.mrf.mxu3 }
  0xc8   : > { %916 = vmatmul.msk.f32.gmra.mxu0 %vm362_vm0, %v469_v37  ;;  %922 = vmatmul.msk.f32.gmra.mxu1 %vm362_vm0, %v469_v37 }
 0x12d   : > { %v386_v38 = vpop.f32.mrf.mxu0  ;;  %v409_v39 = vpop.f32.mrf.mxu1 }
 0x12e   : > { %v462_v47 = vadd.f32 %v461_v40, %v409_v39  ;;  %v439_v50 = vadd.f32 %v438_v43, %v386_v38 }
 0x135   : > { %v389_v41 = vpop.f32.mrf.mxu0  ;;  %v412_v42 = vpop.f32.mrf.mxu1 }
 0x136   : > { %v465_v49 = vadd.f32 %v464_v46, %v412_v42  ;;  %v442_v51 = vadd.f32 %v441_v48, %v389_v41 }
 0x13d   : > { %v493_v44 = vpop.f32.mrf.mxu0  ;;  %v516_v45 = vpop.f32.mrf.mxu1 }
 0x13e   : > { %v523_v52 = vadd.f32 %v516_v45, %v462_v47  ;;  %v522_v56 = vadd.f32 %v493_v44, %v439_v50 }
 0x140   : > { %v539_v60 = vadd.f32 %v531_v59, %v523_v52  ;;  %v538_v63 = vadd.f32 %v531_v59, %v522_v56 }
 0x142   : > { %v543_v6 = vmax.f32 %v539_v60, 0.0  ;;  %v542_v8 = vmax.f32 %v538_v63, 0.0 }
 0x145   : > { %v496_v54 = vpop.f32.mrf.mxu0  ;;  %v519_v55 = vpop.f32.mrf.mxu1 }
 0x146   : > { %v524_v57 = vadd.f32 %v496_v54, %v442_v51  ;;  %v525_v58 = vadd.f32 %v519_v55, %v465_v49 }
 0x148   : > { %v540_v61 = vadd.f32 %v536_v53, %v524_v57  ;;  %v541_v62 = vadd.f32 %v536_v53, %v525_v58 }
 0x14a   : > { %v544_v4 = vmax.f32 %v540_v61, 0.0  ;;  %v545_v5 = vmax.f32 %v541_v62, 0.0 }
 0x14c   : > { %552 = vrot.lane.b32.xlu2 %v545_v5, %s1212_s29  ;;  %678 = vmatpush.msra.mxu1 %v545_v5 }
 0x14d   : > { %564 = vrot.lane.b32.xlu0 %v544_v4, %s1213_s24  ;;  %548 = vrot.lane.b32.xlu1 %v544_v4, %s1212_s29 }
 0x14e   : > { %655 = vmatpush.msra.mxu0 %v544_v4  ;;  %679 = vmatpush.msra.mxu1 %v543_v6 }
 0x14f   : > { %937 = vmatmul.msk.f32.vlgmr.msra.gmra.mxu1 %vm362_vm0, %v578_v10 }
 0x150   : > { %656 = vmatpush.msra.mxu0 %v542_v8 }
 0x151   : > { %935 = vmatmul.msk.f32.vlgmr.msra.gmra.mxu0 %vm362_vm0, %v578_v10 }
 0x154   : > { %550 = vrot.lane.b32.xlu2 %v543_v6, %s1212_s29 }
 0x155   : > { %566 = vrot.lane.b32.xlu0 %v543_v6, %s1213_s24  ;;  %546 = vrot.lane.b32.xlu1 %v542_v8, %s1212_s29  ;;  %s786_s29 = scalar_lea.hbm %s1560_s5, %s957_s7 }
 0x156   : > { %s789_s22 = sshll.u32 %s786_s29, 4  ;;  %s790_s22 = int_to_ptr.hbm [resolvable:$true] %s789_s22 }
 0x157   : > { %938 = vmatmul.msk.f32.gmra.mxu1 %vm362_vm0, %v579_v11  ;;  %s1147_s9 = sshra.s32 %s790_s22, 4  ;;  %s1148_s9 = int_to_ptr.hbm [resolvable:$true] %s1147_s9 }
 0x158   : > { %s1149_s10 = scalar_lea.hbm %s1148_s9, 32  ;;  %p1154_p11 = scmp.lt.s32.totalorder %s1148_s9, %s1560_s5 }
 0x159   : > { %936 = vmatmul.msk.f32.gmra.mxu0 %vm362_vm0, %v579_v11  ;;  %p1150_p1 = scmp.ne.s32.totalorder %s1148_s9, %s1149_s10  ;;  %p1155_p2 = scmp.lt.s32.totalorder %s1153_s28, %s1149_s10 }
 0x15b   : > { %p1151_p4 = pnand %p1150_p1, %p1314_p3  ;;  %p1156_p9 = por %p1155_p2, %p1154_p11 }
 0x15c   : > { %562 = vrot.lane.b32.xlu2 %v542_v8, %s1213_s24 }
 0x15d   : > { %568 = vrot.lane.b32.xlu1 %v545_v5, %s1213_s24  ;;  %s787_s24 = sshll.u32 %s277_s8, 4  ;;  %p1152_p8 = pneg %p1151_p4  ;;  %s788_s24 = int_to_ptr.vmem [resolvable:$true] %s787_s24 }
 0x15f   : > { %p1157_p10 = pnand %p1156_p9, %p1152_p8 }
 0x164   : > { %755 = vperm.xlu2 %1040, %v747_v9  }
 0x165   : > { %750 = vperm.xlu1 %1042, %v746_v16  }
 0x1a6   : > { %v553_v12 = vpop.permute.xlu2 %552 }
 0x1ae   : > { %v551_v20 = vpop.permute.xlu2 %550 }
 0x1b6   : > { %v563_v32 = vpop.permute.xlu2 %562 }
 0x1bf   : > { %v549_v13 = vpop.permute.xlu1 %548  ;;  %v565_v17 = vpop.permute.xlu0 %564 }
 0x1c0   : > { %v557_v14 = vsel %vm321_vm1, %v553_v12, %v549_v13  ;;  %v555_v15 = vsel %vm321_vm1, %v549_v13, %v553_v12 }
 0x1c1   : > { %924 = vmatpush.msk.msrb.mxu2 %vm1401_vm2, %v557_v14  ;;  %930 = vmatpush.msk.msrb.mxu3 %vm1405_vm3, %v555_v15 }
 0x1c7   : > { %v547_v21 = vpop.permute.xlu1 %546  ;;  %v567_v27 = vpop.permute.xlu0 %566 }
 0x1c8   : > { %v556_v23 = vsel %vm321_vm1, %v551_v20, %v547_v21  ;;  %v554_v24 = vsel %vm321_vm1, %v547_v21, %v551_v20  ;;  %v570_v18 = vsel %vm344_vm4, %v563_v32, %v567_v27  ;;  %v572_v19 = vsel %vm344_vm4, %v567_v27, %v563_v32 }
 0x1c9   : > { %926 = vmatpush.msk.msrb.mxu2 %vm1401_vm2, %v556_v23  ;;  %932 = vmatpush.msk.msrb.mxu3 %vm1405_vm3, %v554_v24 }
 0x1ca   : > { %927 = vmatmul.msk.f32.vlgmr.msrb.gmra.mxu2 %vm362_vm0, %v581_v22  ;;  %933 = vmatmul.msk.f32.vlgmr.msrb.gmra.mxu3 %vm362_vm0, %v581_v22 }
 0x1cc   : > { %v681_v38 = vpop.f32.mrf.mxu1 }
 0x1ce   : > { %v658_v25 = vpop.f32.mrf.mxu0 }
 0x1cf   : > { %v569_v28 = vpop.permute.xlu1 %568 }
 0x1d0   : > { %v571_v30 = vsel %vm344_vm4, %v565_v17, %v569_v28  ;;  %v573_v31 = vsel %vm344_vm4, %v569_v28, %v565_v17 }
 0x1d1   : > { %940 = vmatpush.msk.msra.mxu2 %vm1418_vm5, %v571_v30  ;;  %946 = vmatpush.msk.msra.mxu3 %vm1422_vm6, %v573_v31 }
 0x1d2   : > { %928 = vmatmul.msk.f32.gmra.mxu2 %vm362_vm0, %v582_v29  ;;  %934 = vmatmul.msk.f32.gmra.mxu3 %vm362_vm0, %v582_v29 }
 0x1d3   : > { %942 = vmatpush.msk.msra.mxu2 %vm1418_vm5, %v570_v18  ;;  %948 = vmatpush.msk.msra.mxu3 %vm1422_vm6, %v572_v19 }
 0x1d4   : > { %v684_v48 = vpop.f32.mrf.mxu1 }
 0x1d6   : > { %v661_v47 = vpop.f32.mrf.mxu0 }
 0x1d7   : > { %v751_v40 = vpop.permute.xlu1 %750 }
 0x1da   : > { %943 = vmatmul.msk.f32.vlgmr.msra.gmra.mxu2 %vm362_vm0, %v688_v33  ;;  %949 = vmatmul.msk.f32.vlgmr.msra.gmra.mxu3 %vm362_vm0, %v688_v33 }
 0x1e2   : > { %944 = vmatmul.msk.f32.gmra.mxu2 %vm362_vm0, %v689_v34  ;;  %950 = vmatmul.msk.f32.gmra.mxu3 %vm362_vm0, %v689_v34 }
 0x24d   : > { %v606_v7 = vpop.f32.mrf.mxu2  ;;  %v629_v35 = vpop.f32.mrf.mxu3 }
 0x24e   : > { %v659_v39 = vadd.f32 %v658_v25, %v606_v7  ;;  %v682_v26 = vadd.f32 %v681_v38, %v629_v35 }
 0x255   : > { %v609_v36 = vpop.f32.mrf.mxu2  ;;  %v632_v37 = vpop.f32.mrf.mxu3 }
 0x256   : > { %v662_v51 = vadd.f32 %v661_v47, %v609_v36  ;;  %v685_v52 = vadd.f32 %v684_v48, %v632_v37 }
 0x25d   : > { %v713_v41 = vpop.f32.mrf.mxu2  ;;  %v736_v42 = vpop.f32.mrf.mxu3 }
 0x25e   : > { %v742_v43 = vadd.f32 %v713_v41, %v659_v39  ;;  %v743_v44 = vadd.f32 %v736_v42, %v682_v26 }
 0x260   : > { %v758_v45 = vadd.f32 %v751_v40, %v742_v43  ;;  %v759_v46 = vadd.f32 %v751_v40, %v743_v44 }
 0x262   : > { %v762_v49 = vadd.f32 %v758_v45, %v1360_v1  ;;  %v763_v50 = vadd.f32 %v759_v46, %v1372_v3  ;;  %v756_v1 = vpop.permute.xlu2 %755 }
 0x264   : > { %v766_v53 = vmax.f32 %v762_v49, 0.0  ;;  %v767_v54 = vmax.f32 %v763_v50, 0.0 }
 0x265   : > { %v716_v55 = vpop.f32.mrf.mxu2  ;;  %v739_v56 = vpop.f32.mrf.mxu3 }
 0x266   : > { %770 = vst [vmem:[%s277_s8] sm:$0xff] %v766_v53  ;;  %v744_v57 = vadd.f32 %v716_v55, %v662_v51  ;;  %v745_v58 = vadd.f32 %v739_v56, %v685_v52 }
 0x267   : > { %771 = vst [vmem:[%s277_s8 + $0x8] sm:$0xff] %v767_v54 }
 0x268   : > { %v760_v3 = vadd.f32 %v756_v1, %v744_v57  ;;  %v761_v59 = vadd.f32 %v756_v1, %v745_v58 }
 0x26a   : > { %v764_v60 = vadd.f32 %v760_v3, %v1358_v0  ;;  %v765_v61 = vadd.f32 %v761_v59, %v1366_v2 }
 0x26c   : > { %v768_v62 = vmax.f32 %v764_v60, 0.0  ;;  %v769_v63 = vmax.f32 %v765_v61, 0.0 }
 0x26e   : > { %772 = vst [vmem:[%s277_s8 + $0x10] sm:$0xff] %v768_v62 }
 0x26f   : > { %773 = vst [vmem:[%s277_s8 + $0x18] sm:$0xff] %v769_v63 }
 0x270   : > { %1160 = shalt.err (!%p1157_p10)
}
 0x271   : > { %s1215_s16 = smov 256   ;;  %s1216_s26 = smov 512  }
 0x272   : > { %s1217_s7 = smov 16  }
 0x273   : > { %972 = dma.vmem_to_hbm [thread:$0]  (%p1314_p3), %s788_s24, 512, %s790_s22, %s775_s13, %s1215_s16, %s1216_s26, %s1217_s7  }
 0x274 PF: > { %s804_s8 = sand.u32 1, %s1191_s18   ;;  %p1574_p12 = scmp.ge.s32.totalorder %s1203_s21, 2 }
 0x275   : > { %s805_s15 = scalar_lea.sflag [#allocation4], %s804_s8 }
 0x276   : > { %p986_p13 = pnand %p1574_p12, %p1283_p6 }
 0x278   : > { %p987_p0 = pneg %p986_p13 }
 0x27a   : > { %1186 = dma.done.wait (%p987_p0), %s805_s15, 512  }
 0x27b   : > { %1188 = vsyncadd (%p987_p0), %s805_s15, 4294966784  ;;  %p19_p5 = scmp.ge.s32.totalorder %s1304_s14, 4   ;;  %s1575_s18 = smov %s1195_s19 }
 0x27c   : > { %s1576_s19 = smov %s1199_s20  ;;  %s1577_s20 = smov %s1320_s23 }
 0x27d   : > { %s1578_s21 = smov %s1304_s14  ;;  %21 = sbr.rel (!%p19_p5) target bundleno = 6 (0x6), region = 97 }
 0x282   :  { %811 = vsyncpa [#allocation3], 1 }
 0x283   :  { %813 = vsyncpa [#allocation3 + $0x1], 1 }
 0x284   :  { %814 = vsyncpa [#allocation6], 1 }
 0x285   :  { %815 = vsyncpa [#allocation4], 1 }
 0x286   :  { %817 = vsyncpa [#allocation4 + $0x1], 1 }

</bundles_post_ra>
